<compile_context>
chip_gen: v5e
topology: v5e:2x2
jax: 0.10.0
libtpu: 0.0.40
codegen_flags: <defaults>
</compile_context>

<pallas_src>
import math

import numpy as np
import jax
import jax.numpy as jnp
from jax.experimental import pallas as pl
from jax.experimental.pallas import tpu as pltpu


_VMEM_LIMIT_BYTES = 32 * 1024 * 1024    # safe on v5e / v6e / v7x
_MAX_ROW_TILE = 256                     # rows per block when B*T is large


def _row_tile(bt, max_tile=_MAX_ROW_TILE):
    """Pick a row (sublane) tile: full slab when small, else 8-aligned tiles."""
    if bt <= max_tile or bt % 8 != 0:
        return bt, 1                     # single full block (always legal)
    return max_tile, pl.cdiv(bt, max_tile)


# ---------------- beta schedule (host-side glue, mirrors __init__) -----------
def betas_for_alpha_bar(num_diffusion_timesteps, alpha_bar, max_beta=0.999):
    betas = []
    for i in range(num_diffusion_timesteps):
        t1 = i / num_diffusion_timesteps
        t2 = (i + 1) / num_diffusion_timesteps
        betas.append(min(1 - alpha_bar(t2) / alpha_bar(t1), max_beta))
    return np.asarray(betas, dtype=np.float32)


# ---------------- Pallas kernels ---------------------------------------------
def _qsample_multi_kernel(sa_ref, sb_ref,
                          xl_ref, xr_ref, xo_ref,
                          el_ref, er_ref, eo_ref,
                          ol_ref, or_ref, oo_ref):
    """x_tilde_s = sa*x_s + sb*eps_s for the three streams, full-block VPU ops.

    sa/sb: (tile_m, 1) f32 per-row scale columns (lane-broadcast).
    Streams: (tile_m, F_s) blocks; three separate outputs (no concat/slice)."""
    sa = sa_ref[...]
    sb = sb_ref[...]
    ol_ref[...] = (sa * xl_ref[...] + sb * el_ref[...]).astype(ol_ref.dtype)
    or_ref[...] = (sa * xr_ref[...] + sb * er_ref[...]).astype(or_ref.dtype)
    oo_ref[...] = (sa * xo_ref[...] + sb * eo_ref[...]).astype(oo_ref.dtype)


def _denoise_kernel(xl_ref, xr_ref, xo_ref,
                    wl_ref, wr_ref, wo_ref,
                    bl_ref, br_ref, bo_ref,
                    ol_ref, or_ref, oo_ref):
    """pred_s = x_s @ W_s + b_s, one small matmul per stream (bf16 MXU, f32 acc)."""
    def stream(x_ref, w_ref, b_ref, o_ref):
        y = jnp.dot(x_ref[...].astype(w_ref.dtype), w_ref[...],
                    preferred_element_type=jnp.float32)
        o_ref[...] = (y + b_ref[...]).astype(o_ref.dtype)

    stream(xl_ref, wl_ref, bl_ref, ol_ref)
    stream(xr_ref, wr_ref, br_ref, or_ref)
    stream(xo_ref, wo_ref, bo_ref, oo_ref)


def _fused_qsample_denoise_kernel(sa_ref, sb_ref,
                                  xl_ref, xr_ref, xo_ref,
                                  el_ref, er_ref, eo_ref,
                                  wl_ref, wr_ref, wo_ref,
                                  bl_ref, br_ref, bo_ref,
                                  ol_ref, or_ref, oo_ref):
    """Training forward: q_sample (VPU, f32) + per-stream linear (MXU) fused.

    x_tilde stays in vregs/VMEM — never written back to HBM."""
    sa = sa_ref[...]
    sb = sb_ref[...]

    def stream(x_ref, e_ref, w_ref, b_ref, o_ref):
        xt = sa * x_ref[...] + sb * e_ref[...]                 # f32 q_sample
        y = jnp.dot(xt.astype(w_ref.dtype), w_ref[...],        # bf16 MXU
                    preferred_element_type=jnp.float32)
        o_ref[...] = (y + b_ref[...]).astype(o_ref.dtype)

    stream(xl_ref, el_ref, wl_ref, bl_ref, ol_ref)
    stream(xr_ref, er_ref, wr_ref, br_ref, or_ref)
    stream(xo_ref, eo_ref, wo_ref, bo_ref, oo_ref)


# ---------------- wrappers -----------------------------------------------------
def _scale_columns(sqrt_ab, sqrt_1mab, T):
    """(B,) -> batch-major (B*T, 1) f32 per-row scale columns."""
    sa = jnp.repeat(sqrt_ab.astype(jnp.float32), T)[:, None]
    sb = jnp.repeat(sqrt_1mab.astype(jnp.float32), T)[:, None]
    return sa, sb


def _compiler_params():
    return pltpu.CompilerParams(dimension_semantics=("parallel",),
                                vmem_limit_bytes=_VMEM_LIMIT_BYTES)


def q_sample_multi(sqrt_ab, sqrt_1mab, xs, epss):
    """Forward diffusion of three streams in ONE pallas_call, three outputs.

    xs / epss: tuples of (B, T, F_s). No concatenation: the three streams go
    in and come out as separate lane-dense refs; rows (B*T) are tiled."""
    B, T = xs[0].shape[0], xs[0].shape[1]
    BT = B * T
    feats = tuple(int(x.shape[-1]) for x in xs)
    sa_col, sb_col = _scale_columns(sqrt_ab, sqrt_1mab, T)
    xs2 = [x.reshape(BT, f) for x, f in zip(xs, feats)]
    es2 = [e.reshape(BT, f) for e, f in zip(epss, feats)]
    tile_m, grid_m = _row_tile(BT)

    def row(f):
        return pl.BlockSpec((tile_m, f), lambda i: (i, 0))

    outs = pl.pallas_call(
        _qsample_multi_kernel,
        out_shape=tuple(jax.ShapeDtypeStruct((BT, f), x.dtype)
                        for f, x in zip(feats, xs)),
        grid=(grid_m,),
        in_specs=[row(1), row(1),
                  row(feats[0]), row(feats[1]), row(feats[2]),
                  row(feats[0]), row(feats[1]), row(feats[2])],
        out_specs=tuple(row(f) for f in feats),
        compiler_params=_compiler_params(),
    )(sa_col, sb_col, *xs2, *es2)
    return tuple(o.reshape(B, T, f) for o, f in zip(outs, feats))


# ---------------- Synthetic denoiser (stand-in for external `model`) ---------
class SyntheticDenoiser:
    """Deterministic stand-in for the external learned `model` argument.

    Weights are stored in bf16 (MXU-native; halves weight HBM/VMEM traffic on
    v6e/v7x); accumulation is f32. Exposes a fused q_sample+denoise entry
    point so the whole training forward pass is a single pallas_call."""

    def __init__(self, key, hand_nfeats, obj_nfeats):
        k1, k2, k3, k4, k5, k6 = jax.random.split(key, 6)
        s = 0.02
        self.hand_nfeats = hand_nfeats
        self.obj_nfeats = obj_nfeats
        self.w_l = (s * jax.random.normal(k1, (hand_nfeats, hand_nfeats),
                                          jnp.float32)).astype(jnp.bfloat16)
        self.b_l = s * jax.random.normal(k2, (1, hand_nfeats), jnp.float32)
        self.w_r = (s * jax.random.normal(k3, (hand_nfeats, hand_nfeats),
                                          jnp.float32)).astype(jnp.bfloat16)
        self.b_r = s * jax.random.normal(k4, (1, hand_nfeats), jnp.float32)
        self.w_o = (s * jax.random.normal(k5, (obj_nfeats, obj_nfeats),
                                          jnp.float32)).astype(jnp.bfloat16)
        self.b_o = s * jax.random.normal(k6, (1, obj_nfeats), jnp.float32)

    # ---- shared spec helpers ----
    def _weight_specs(self):
        full = lambda a: pl.BlockSpec(a.shape, lambda i: (0, 0))
        return [full(self.w_l), full(self.w_r), full(self.w_o),
                full(self.b_l), full(self.b_r), full(self.b_o)]

    def _weights(self):
        return (self.w_l, self.w_r, self.w_o, self.b_l, self.b_r, self.b_o)

    # ---- plain denoise (used in the timesteps-given / sampling path) ----
    def __call__(self, x_l, x_r, x_o, obj_feat, timesteps, enc_text,
                 valid_mask_lhand=None, valid_mask_rhand=None,
                 valid_mask_obj=None):
        B, T, _ = x_l.shape
        BT = B * T
        feats = (x_l.shape[-1], x_r.shape[-1], x_o.shape[-1])
        xs2 = [x.reshape(BT, f) for x, f in zip((x_l, x_r, x_o), feats)]
        tile_m, grid_m = _row_tile(BT)
        row = lambda f: pl.BlockSpec((tile_m, f), lambda i: (i, 0))

        outs = pl.pallas_call(
            _denoise_kernel,
            out_shape=tuple(jax.ShapeDtypeStruct((BT, f), x_l.dtype)
                            for f in feats),
            grid=(grid_m,),
            in_specs=[row(feats[0]), row(feats[1]), row(feats[2])]
                     + self._weight_specs(),
            out_specs=tuple(row(f) for f in feats),
            compiler_params=_compiler_params(),
        )(*xs2, *self._weights())
        return tuple(o.reshape(B, T, f) for o, f in zip(outs, feats))

    # ---- fused q_sample + denoise (training path, ONE pallas_call) ----
    def denoise_from_noise(self, x_l, x_r, x_o, eps_l, eps_r, eps_o,
                           sqrt_ab, sqrt_1mab, obj_feat, timesteps, enc_text,
                           valid_mask_lhand=None, valid_mask_rhand=None,
                           valid_mask_obj=None):
        B, T, _ = x_l.shape
        BT = B * T
        feats = (x_l.shape[-1], x_r.shape[-1], x_o.shape[-1])
        sa_col, sb_col = _scale_columns(sqrt_ab, sqrt_1mab, T)
        xs2 = [x.reshape(BT, f) for x, f in zip((x_l, x_r, x_o), feats)]
        es2 = [e.reshape(BT, f) for e, f in zip((eps_l, eps_r, eps_o), feats)]
        tile_m, grid_m = _row_tile(BT)
        row = lambda f: pl.BlockSpec((tile_m, f), lambda i: (i, 0))

        outs = pl.pallas_call(
            _fused_qsample_denoise_kernel,
            out_shape=tuple(jax.ShapeDtypeStruct((BT, f), x_l.dtype)
                            for f in feats),
            grid=(grid_m,),
            in_specs=[row(1), row(1),
                      row(feats[0]), row(feats[1]), row(feats[2]),
                      row(feats[0]), row(feats[1]), row(feats[2])]
                     + self._weight_specs(),
            out_specs=tuple(row(f) for f in feats),
            compiler_params=_compiler_params(),
        )(sa_col, sb_col, *xs2, *es2, *self._weights())
        return tuple(o.reshape(B, T, f) for o, f in zip(outs, feats))


# ---------------- Diffusion module (JAX port) ---------------------------------
class Diffusion:
    def __init__(self, lhand_layer=None, rhand_layer=None, beta_1=0.0001,
                 beta_T=0.02, T=1000, schedule_name="cosine"):
        self.lhand_layer = lhand_layer
        self.rhand_layer = rhand_layer
        self.beta_1 = beta_1
        self.beta_T = beta_T
        self.T = T
        if schedule_name == "linear":
            betas = np.linspace(beta_1, beta_T, T, dtype=np.float32)
        elif schedule_name == "cosine":
            betas = betas_for_alpha_bar(
                T, lambda t: math.cos((t + 0.008) / 1.008 * math.pi / 2) ** 2)
        else:
            raise ValueError(schedule_name)
        alphas = 1.0 - betas
        alpha_bars = np.cumprod(alphas, axis=0)
        alpha_prev_bars = np.concatenate([np.ones((1,), np.float32),
                                          alpha_bars[:-1]])
        sigmas = np.sqrt((1 - alpha_prev_bars) / (1 - alpha_bars)) * np.sqrt(
            1 - alpha_bars / alpha_prev_bars)
        posterior_variance = betas * (1.0 - alpha_prev_bars) / (1.0 - alpha_bars)
        posterior_log_variance_clipped = np.log(
            np.concatenate([posterior_variance[1:2], posterior_variance[1:]]))
        self.betas = jnp.asarray(betas)
        self.alphas = jnp.asarray(alphas)
        self.alpha_bars = jnp.asarray(alpha_bars)
        self.alpha_prev_bars = jnp.asarray(alpha_prev_bars)
        self.sigmas = jnp.asarray(sigmas)
        self.posterior_variance = jnp.asarray(posterior_variance)
        self.posterior_log_variance_clipped = jnp.asarray(
            posterior_log_variance_clipped)

    def forward(self, model, x_lhand, x_rhand, x_obj, obj_feat, timesteps=None,
                enc_text=None, get_target=False, get_losses=False,
                valid_mask_lhand=None, valid_mask_rhand=None,
                valid_mask_obj=None, ldist_map=None, rdist_map=None,
                obj_verts_org=None, loss_lambda_dict=None, dataset_name=None,
                obj_pc_top_idx=None, rng=None):
        assert enc_text is not None
        return_list = []
        B = x_obj.shape[0]
        epsilon_lhand = epsilon_rhand = epsilon_obj = None
        used_alpha_bars = None
        if timesteps is None:
            assert rng is not None, "pass rng= to mirror torch.randint/randn"
            k_t, k_l, k_r, k_o = jax.random.split(rng, 4)
            timesteps = jax.random.randint(k_t, (B,), 0,
                                           self.alpha_bars.shape[0])
            used_alpha_bars = self.alpha_bars[timesteps]                 # (B,)
            sqrt_ab = jnp.sqrt(used_alpha_bars)
            sqrt_1mab = jnp.sqrt(1.0 - used_alpha_bars)
            epsilon_lhand = jax.random.normal(k_l, x_lhand.shape, x_lhand.dtype)
            epsilon_rhand = jax.random.normal(k_r, x_rhand.shape, x_rhand.dtype)
            epsilon_obj = jax.random.normal(k_o, x_obj.shape, x_obj.dtype)
            if hasattr(model, "denoise_from_noise"):
                # Fully fused: q_sample + denoiser in one pallas_call; x_tilde
                # never touches HBM.
                pred_X0_lhand, pred_X0_rhand, pred_X0_obj = \
                    model.denoise_from_noise(
                        x_lhand, x_rhand, x_obj,
                        epsilon_lhand, epsilon_rhand, epsilon_obj,
                        sqrt_ab, sqrt_1mab, obj_feat, timesteps, enc_text,
                        valid_mask_lhand, valid_mask_rhand, valid_mask_obj)
            else:
                # External model: one fused q_sample kernel for all streams,
                # then the model.
                x_tilde_lhand, x_tilde_rhand, x_tilde_obj = q_sample_multi(
                    sqrt_ab, sqrt_1mab,
                    (x_lhand, x_rhand, x_obj),
                    (epsilon_lhand, epsilon_rhand, epsilon_obj))
                pred_X0_lhand, pred_X0_rhand, pred_X0_obj = model(
                    x_tilde_lhand, x_tilde_rhand, x_tilde_obj, obj_feat,
                    timesteps, enc_text, valid_mask_lhand, valid_mask_rhand,
                    valid_mask_obj)
        else:
            timesteps = jnp.full((B,), timesteps, dtype=jnp.int32)
            pred_X0_lhand, pred_X0_rhand, pred_X0_obj = model(
                x_lhand, x_rhand, x_obj, obj_feat, timesteps, enc_text,
                valid_mask_lhand, valid_mask_rhand, valid_mask_obj)
        return_list.append(pred_X0_lhand)
        return_list.append(pred_X0_rhand)
        return_list.append(pred_X0_obj)
        if get_losses:
            # TODO(synk): get_loss depends on external project helpers
            # (get_l2_loss, get_hand_obj_dist_map, get_distance_map_loss,
            # get_relative_orientation_loss) not defined in this module.
            pass
        if get_target:
            if epsilon_lhand is None:
                raise ValueError(
                    "get_target=True requires timesteps=None (noise / "
                    "alpha_bar are only drawn in that branch).")
            return_list.append(epsilon_lhand)
            return_list.append(epsilon_rhand)
            return_list.append(epsilon_obj)
            return_list.append(used_alpha_bars[:, None, None])
        return return_list


if __name__ == "__main__":
    key = jax.random.PRNGKey(0)
    k_model, k_xl, k_xr, k_xo, k_obj, k_text, k_fwd = jax.random.split(key, 7)

    B, n_frames, hand_nfeats, obj_nfeats = 2, 8, 32, 16
    text_dim, objfeat_dim = 32, 16
    x_lhand = jax.random.normal(k_xl, (B, n_frames, hand_nfeats), jnp.float32)
    x_rhand = jax.random.normal(k_xr, (B, n_frames, hand_nfeats), jnp.float32)
    x_obj = jax.random.normal(k_xo, (B, n_frames, obj_nfeats), jnp.float32)
    obj_feat = jax.random.normal(k_obj, (B, objfeat_dim), jnp.float32)
    enc_text = jax.random.normal(k_text, (B, text_dim), jnp.float32)

    diffusion = Diffusion(lhand_layer=None, rhand_layer=None, T=1000,
                          schedule_name="cosine")
    model = SyntheticDenoiser(k_model, hand_nfeats, obj_nfeats)

    # f32 views of the bf16-stored weights (what the kernel actually multiplies)
    w_l32 = model.w_l.astype(jnp.float32)
    w_r32 = model.w_r.astype(jnp.float32)
    w_o32 = model.w_o.astype(jnp.float32)

    # ---- training-style forward (fused path: ONE pallas_call) ----
    outs = diffusion.forward(model, x_lhand, x_rhand, x_obj, obj_feat,
                             timesteps=None, enc_text=enc_text,
                             get_target=True, rng=k_fwd)
    outs = jax.block_until_ready(outs)

    # pure-JAX references
    eps_l, eps_r, eps_o = outs[3], outs[4], outs[5]
    used_ab = outs[6][:, 0, 0]                                        # (B,)
    sab = jnp.sqrt(used_ab)[:, None, None]
    s1mab = jnp.sqrt(1.0 - used_ab)[:, None, None]
    xt_l = sab * x_lhand + s1mab * eps_l
    xt_r = sab * x_rhand + s1mab * eps_r
    xt_o = sab * x_obj + s1mab * eps_o

    def bf16_round(a):
        return a.astype(jnp.bfloat16).astype(jnp.float32)

    pred_l_ref = jnp.einsum('btf,fg->btg', bf16_round(xt_l), w_l32) + model.b_l
    pred_r_ref = jnp.einsum('btf,fg->btg', bf16_round(xt_r), w_r32) + model.b_r
    pred_o_ref = jnp.einsum('btf,fg->btg', bf16_round(xt_o), w_o32) + model.b_o
    assert jnp.allclose(pred_l_ref, outs[0], atol=2e-3, rtol=2e-3), "fused lhand mismatch"
    assert jnp.allclose(pred_r_ref, outs[1], atol=2e-3, rtol=2e-3), "fused rhand mismatch"
    assert jnp.allclose(pred_o_ref, outs[2], atol=2e-3, rtol=2e-3), "fused obj mismatch"

    # ---- standalone (fallback) fused q_sample kernel ----
    q_l, q_r, q_o = q_sample_multi(jnp.sqrt(used_ab), jnp.sqrt(1.0 - used_ab),
                                   (x_lhand, x_rhand, x_obj),
                                   (eps_l, eps_r, eps_o))
    q_l, q_r, q_o = jax.block_until_ready((q_l, q_r, q_o))
    assert jnp.allclose(q_l, xt_l, atol=1e-5), "q_sample lhand mismatch"
    assert jnp.allclose(q_r, xt_r, atol=1e-5), "q_sample rhand mismatch"
    assert jnp.allclose(q_o, xt_o, atol=1e-5), "q_sample obj mismatch"

    # ---- sampling-style forward (timesteps given) exercises the plain denoiser ----
    outs2 = diffusion.forward(model, x_lhand, x_rhand, x_obj, obj_feat,
                              timesteps=5, enc_text=enc_text)
    outs2 = jax.block_until_ready(outs2)
    pred_l2_ref = jnp.einsum('btf,fg->btg', bf16_round(x_lhand), w_l32) + model.b_l
    pred_o2_ref = jnp.einsum('btf,fg->btg', bf16_round(x_obj), w_o32) + model.b_o
    assert jnp.allclose(pred_l2_ref, outs2[0], atol=2e-3, rtol=2e-3), "denoise lhand mismatch"
    assert jnp.allclose(pred_o2_ref, outs2[2], atol=2e-3, rtol=2e-3), "denoise obj mismatch"

    print("KERNEL_OK")
</pallas_src>

<mosaic_0001>
module attributes {stable_mosaic.version = 11 : i64} {
  func.func @_fused_qsample_denoise_kernel(%arg0: i32, %arg1: memref<16x1xf32, #tpu.memory_space<vmem>>, %arg2: memref<16x1xf32, #tpu.memory_space<vmem>>, %arg3: memref<16x32xf32, #tpu.memory_space<vmem>>, %arg4: memref<16x32xf32, #tpu.memory_space<vmem>>, %arg5: memref<16x16xf32, #tpu.memory_space<vmem>>, %arg6: memref<16x32xf32, #tpu.memory_space<vmem>>, %arg7: memref<16x32xf32, #tpu.memory_space<vmem>>, %arg8: memref<16x16xf32, #tpu.memory_space<vmem>>, %arg9: memref<32x32xbf16, #tpu.memory_space<vmem>>, %arg10: memref<32x32xbf16, #tpu.memory_space<vmem>>, %arg11: memref<16x16xbf16, #tpu.memory_space<vmem>>, %arg12: memref<1x32xf32, #tpu.memory_space<vmem>>, %arg13: memref<1x32xf32, #tpu.memory_space<vmem>>, %arg14: memref<1x16xf32, #tpu.memory_space<vmem>>, %arg15: memref<16x32xf32, #tpu.memory_space<vmem>>, %arg16: memref<16x32xf32, #tpu.memory_space<vmem>>, %arg17: memref<16x16xf32, #tpu.memory_space<vmem>>) attributes {dimension_semantics = [#tpu.dimension_semantics<parallel>], iteration_bounds = array<i64: 1>, scalar_prefetch = 0 : i64, scratch_operands = 0 : i64, tpu.core_type = #tpu.core_type<tc>, window_params = [{transform_indices = @transform_0, window_bounds = array<i64: 16, 1>}, {transform_indices = @transform_1, window_bounds = array<i64: 16, 1>}, {transform_indices = @transform_2, window_bounds = array<i64: 16, 32>}, {transform_indices = @transform_3, window_bounds = array<i64: 16, 32>}, {transform_indices = @transform_4, window_bounds = array<i64: 16, 16>}, {transform_indices = @transform_5, window_bounds = array<i64: 16, 32>}, {transform_indices = @transform_6, window_bounds = array<i64: 16, 32>}, {transform_indices = @transform_7, window_bounds = array<i64: 16, 16>}, {pipeline_mode = #tpu.pipeline_mode<synchronous>, transform_indices = @transform_8, window_bounds = array<i64: 32, 32>}, {pipeline_mode = #tpu.pipeline_mode<synchronous>, transform_indices = @transform_9, window_bounds = array<i64: 32, 32>}, {pipeline_mode = #tpu.pipeline_mode<synchronous>, transform_indices = @transform_10, window_bounds = array<i64: 16, 16>}, {pipeline_mode = #tpu.pipeline_mode<synchronous>, transform_indices = @transform_11, window_bounds = array<i64: 1, 32>}, {pipeline_mode = #tpu.pipeline_mode<synchronous>, transform_indices = @transform_12, window_bounds = array<i64: 1, 32>}, {pipeline_mode = #tpu.pipeline_mode<synchronous>, transform_indices = @transform_13, window_bounds = array<i64: 1, 16>}, {transform_indices = @transform_14, window_bounds = array<i64: 16, 32>}, {transform_indices = @transform_15, window_bounds = array<i64: 16, 32>}, {transform_indices = @transform_16, window_bounds = array<i64: 16, 16>}]} {
    %c0 = arith.constant 0 : index
    %c0_0 = arith.constant 0 : index
    %0 = vector.load %arg1[%c0, %c0_0] : memref<16x1xf32, #tpu.memory_space<vmem>>, vector<16x1xf32>
    %c0_1 = arith.constant 0 : index
    %c0_2 = arith.constant 0 : index
    %1 = vector.load %arg2[%c0_1, %c0_2] : memref<16x1xf32, #tpu.memory_space<vmem>>, vector<16x1xf32>
    %c0_3 = arith.constant 0 : index
    %c0_4 = arith.constant 0 : index
    %2 = vector.load %arg3[%c0_3, %c0_4] : memref<16x32xf32, #tpu.memory_space<vmem>>, vector<16x32xf32>
    %3 = vector.broadcast %0 : vector<16x1xf32> to vector<16x32xf32>
    %4 = arith.mulf %3, %2 : vector<16x32xf32>
    %c0_5 = arith.constant 0 : index
    %c0_6 = arith.constant 0 : index
    %5 = vector.load %arg6[%c0_5, %c0_6] : memref<16x32xf32, #tpu.memory_space<vmem>>, vector<16x32xf32>
    %6 = vector.broadcast %1 : vector<16x1xf32> to vector<16x32xf32>
    %7 = arith.mulf %6, %5 : vector<16x32xf32>
    %8 = arith.addf %4, %7 : vector<16x32xf32>
    %9 = arith.truncf %8 : vector<16x32xf32> to vector<16x32xbf16>
    %c0_7 = arith.constant 0 : index
    %c0_8 = arith.constant 0 : index
    %10 = vector.load %arg9[%c0_7, %c0_8] : memref<32x32xbf16, #tpu.memory_space<vmem>>, vector<32x32xbf16>
    %cst = arith.constant dense<0.000000e+00> : vector<16x32xf32>
    %11 = tpu.matmul %9, %10, %cst {dimension_numbers = #tpu.dot_dimension_numbers<[1], [0], [0], [1], [0, 0, 1, 1], [], []>} : vector<16x32xbf16>, vector<32x32xbf16>, vector<16x32xf32> -> vector<16x32xf32>
    %c0_9 = arith.constant 0 : index
    %c0_10 = arith.constant 0 : index
    %12 = vector.load %arg12[%c0_9, %c0_10] : memref<1x32xf32, #tpu.memory_space<vmem>>, vector<1x32xf32>
    %13 = vector.broadcast %12 : vector<1x32xf32> to vector<16x32xf32>
    %14 = arith.addf %11, %13 : vector<16x32xf32>
    %c0_11 = arith.constant 0 : index
    %c0_12 = arith.constant 0 : index
    %15 = vector.load %arg15[%c0_11, %c0_12] : memref<16x32xf32, #tpu.memory_space<vmem>>, vector<16x32xf32>
    tpu.vector_store %arg15[%c0_11, %c0_12], %14 {strides = array<i32>} : memref<16x32xf32, #tpu.memory_space<vmem>>, vector<16x32xf32>,
    %c0_13 = arith.constant 0 : index
    %c0_14 = arith.constant 0 : index
    %16 = vector.load %arg4[%c0_13, %c0_14] : memref<16x32xf32, #tpu.memory_space<vmem>>, vector<16x32xf32>
    %17 = vector.broadcast %0 : vector<16x1xf32> to vector<16x32xf32>
    %18 = arith.mulf %17, %16 : vector<16x32xf32>
    %c0_15 = arith.constant 0 : index
    %c0_16 = arith.constant 0 : index
    %19 = vector.load %arg7[%c0_15, %c0_16] : memref<16x32xf32, #tpu.memory_space<vmem>>, vector<16x32xf32>
    %20 = vector.broadcast %1 : vector<16x1xf32> to vector<16x32xf32>
    %21 = arith.mulf %20, %19 : vector<16x32xf32>
    %22 = arith.addf %18, %21 : vector<16x32xf32>
    %23 = arith.truncf %22 : vector<16x32xf32> to vector<16x32xbf16>
    %c0_17 = arith.constant 0 : index
    %c0_18 = arith.constant 0 : index
    %24 = vector.load %arg10[%c0_17, %c0_18] : memref<32x32xbf16, #tpu.memory_space<vmem>>, vector<32x32xbf16>
    %cst_19 = arith.constant dense<0.000000e+00> : vector<16x32xf32>
    %25 = tpu.matmul %23, %24, %cst_19 {dimension_numbers = #tpu.dot_dimension_numbers<[1], [0], [0], [1], [0, 0, 1, 1], [], []>} : vector<16x32xbf16>, vector<32x32xbf16>, vector<16x32xf32> -> vector<16x32xf32>
    %c0_20 = arith.constant 0 : index
    %c0_21 = arith.constant 0 : index
    %26 = vector.load %arg13[%c0_20, %c0_21] : memref<1x32xf32, #tpu.memory_space<vmem>>, vector<1x32xf32>
    %27 = vector.broadcast %26 : vector<1x32xf32> to vector<16x32xf32>
    %28 = arith.addf %25, %27 : vector<16x32xf32>
    %c0_22 = arith.constant 0 : index
    %c0_23 = arith.constant 0 : index
    %29 = vector.load %arg16[%c0_22, %c0_23] : memref<16x32xf32, #tpu.memory_space<vmem>>, vector<16x32xf32>
    tpu.vector_store %arg16[%c0_22, %c0_23], %28 {strides = array<i32>} : memref<16x32xf32, #tpu.memory_space<vmem>>, vector<16x32xf32>,
    %c0_24 = arith.constant 0 : index
    %c0_25 = arith.constant 0 : index
    %30 = vector.load %arg5[%c0_24, %c0_25] : memref<16x16xf32, #tpu.memory_space<vmem>>, vector<16x16xf32>
    %31 = vector.broadcast %0 : vector<16x1xf32> to vector<16x16xf32>
    %32 = arith.mulf %31, %30 : vector<16x16xf32>
    %c0_26 = arith.constant 0 : index
    %c0_27 = arith.constant 0 : index
    %33 = vector.load %arg8[%c0_26, %c0_27] : memref<16x16xf32, #tpu.memory_space<vmem>>, vector<16x16xf32>
    %34 = vector.broadcast %1 : vector<16x1xf32> to vector<16x16xf32>
    %35 = arith.mulf %34, %33 : vector<16x16xf32>
    %36 = arith.addf %32, %35 : vector<16x16xf32>
    %37 = arith.truncf %36 : vector<16x16xf32> to vector<16x16xbf16>
    %c0_28 = arith.constant 0 : index
    %c0_29 = arith.constant 0 : index
    %38 = vector.load %arg11[%c0_28, %c0_29] : memref<16x16xbf16, #tpu.memory_space<vmem>>, vector<16x16xbf16>
    %cst_30 = arith.constant dense<0.000000e+00> : vector<16x16xf32>
    %39 = tpu.matmul %37, %38, %cst_30 {dimension_numbers = #tpu.dot_dimension_numbers<[1], [0], [0], [1], [0, 0, 1, 1], [], []>} : vector<16x16xbf16>, vector<16x16xbf16>, vector<16x16xf32> -> vector<16x16xf32>
    %c0_31 = arith.constant 0 : index
    %c0_32 = arith.constant 0 : index
    %40 = vector.load %arg14[%c0_31, %c0_32] : memref<1x16xf32, #tpu.memory_space<vmem>>, vector<1x16xf32>
    %41 = vector.broadcast %40 : vector<1x16xf32> to vector<16x16xf32>
    %42 = arith.addf %39, %41 : vector<16x16xf32>
    %c0_33 = arith.constant 0 : index
    %c0_34 = arith.constant 0 : index
    %43 = vector.load %arg17[%c0_33, %c0_34] : memref<16x16xf32, #tpu.memory_space<vmem>>, vector<16x16xf32>
    tpu.vector_store %arg17[%c0_33, %c0_34], %42 {strides = array<i32>} : memref<16x16xf32, #tpu.memory_space<vmem>>, vector<16x16xf32>,
    return
  }
  func.func @transform_0(%arg0: i32) -> (i32, i32) {
    %c0_i32 = arith.constant 0 : i32
    %c0_i32_0 = arith.constant 0 : i32
    return %arg0, %c0_i32 : i32, i32
  }
  func.func @transform_1(%arg0: i32) -> (i32, i32) {
    %c0_i32 = arith.constant 0 : i32
    %c0_i32_0 = arith.constant 0 : i32
    return %arg0, %c0_i32 : i32, i32
  }
  func.func @transform_2(%arg0: i32) -> (i32, i32) {
    %c0_i32 = arith.constant 0 : i32
    %c0_i32_0 = arith.constant 0 : i32
    return %arg0, %c0_i32 : i32, i32
  }
  func.func @transform_3(%arg0: i32) -> (i32, i32) {
    %c0_i32 = arith.constant 0 : i32
    %c0_i32_0 = arith.constant 0 : i32
    return %arg0, %c0_i32 : i32, i32
  }
  func.func @transform_4(%arg0: i32) -> (i32, i32) {
    %c0_i32 = arith.constant 0 : i32
    %c0_i32_0 = arith.constant 0 : i32
    return %arg0, %c0_i32 : i32, i32
  }
  func.func @transform_5(%arg0: i32) -> (i32, i32) {
    %c0_i32 = arith.constant 0 : i32
    %c0_i32_0 = arith.constant 0 : i32
    return %arg0, %c0_i32 : i32, i32
  }
  func.func @transform_6(%arg0: i32) -> (i32, i32) {
    %c0_i32 = arith.constant 0 : i32
    %c0_i32_0 = arith.constant 0 : i32
    return %arg0, %c0_i32 : i32, i32
  }
  func.func @transform_7(%arg0: i32) -> (i32, i32) {
    %c0_i32 = arith.constant 0 : i32
    %c0_i32_0 = arith.constant 0 : i32
    return %arg0, %c0_i32 : i32, i32
  }
  func.func @transform_8(%arg0: i32) -> (i32, i32) {
    %c0_i32 = arith.constant 0 : i32
    %c0_i32_0 = arith.constant 0 : i32
    %c0_i32_1 = arith.constant 0 : i32
    return %c0_i32, %c0_i32_0 : i32, i32
  }
  func.func @transform_9(%arg0: i32) -> (i32, i32) {
    %c0_i32 = arith.constant 0 : i32
    %c0_i32_0 = arith.constant 0 : i32
    %c0_i32_1 = arith.constant 0 : i32
    return %c0_i32, %c0_i32_0 : i32, i32
  }
  func.func @transform_10(%arg0: i32) -> (i32, i32) {
    %c0_i32 = arith.constant 0 : i32
    %c0_i32_0 = arith.constant 0 : i32
    %c0_i32_1 = arith.constant 0 : i32
    return %c0_i32, %c0_i32_0 : i32, i32
  }
  func.func @transform_11(%arg0: i32) -> (i32, i32) {
    %c0_i32 = arith.constant 0 : i32
    %c0_i32_0 = arith.constant 0 : i32
    %c0_i32_1 = arith.constant 0 : i32
    return %c0_i32, %c0_i32_0 : i32, i32
  }
  func.func @transform_12(%arg0: i32) -> (i32, i32) {
    %c0_i32 = arith.constant 0 : i32
    %c0_i32_0 = arith.constant 0 : i32
    %c0_i32_1 = arith.constant 0 : i32
    return %c0_i32, %c0_i32_0 : i32, i32
  }
  func.func @transform_13(%arg0: i32) -> (i32, i32) {
    %c0_i32 = arith.constant 0 : i32
    %c0_i32_0 = arith.constant 0 : i32
    %c0_i32_1 = arith.constant 0 : i32
    return %c0_i32, %c0_i32_0 : i32, i32
  }
  func.func @transform_14(%arg0: i32) -> (i32, i32) {
    %c0_i32 = arith.constant 0 : i32
    %c0_i32_0 = arith.constant 0 : i32
    return %arg0, %c0_i32 : i32, i32
  }
  func.func @transform_15(%arg0: i32) -> (i32, i32) {
    %c0_i32 = arith.constant 0 : i32
    %c0_i32_0 = arith.constant 0 : i32
    return %arg0, %c0_i32 : i32, i32
  }
  func.func @transform_16(%arg0: i32) -> (i32, i32) {
    %c0_i32 = arith.constant 0 : i32
    %c0_i32_0 = arith.constant 0 : i32
    return %arg0, %c0_i32 : i32, i32
  }
}

</mosaic_0001>

<bundles_post_ra>
// kernel: tpu_custom_call.1
= control target key start
LH: loop header
LB: loop body
LE: loop exit
PB: predicated region body
PF: predicated region fallthrough
CT: control target
= control target key end

     0   :  { %s839_s0 = inlined_call_operand.vmem [shape: f32[16,1], index: 0, kind: input, shape index: {}]   ;;  %s840_s1 = inlined_call_operand.vmem [shape: f32[16,1], index: 1, kind: input, shape index: {}]   ;;  %s841_s2 = inlined_call_operand.vmem [shape: f32[16,32], index: 2, kind: input, shape index: {}]   ;;  %s842_s3 = inlined_call_operand.vmem [shape: f32[16,32], index: 3, kind: input, shape index: {}]   ;;  %s843_s4 = inlined_call_operand.hbm [shape: f32[16,16], index: 4, kind: input, shape index: {}]   ;;  %s844_s5 = inlined_call_operand.hbm [shape: f32[16,32], index: 5, kind: input, shape index: {}]   ;;  %s845_s6 = inlined_call_operand.hbm [shape: f32[16,32], index: 6, kind: input, shape index: {}]   ;;  %s846_s7 = inlined_call_operand.hbm [shape: f32[16,16], index: 7, kind: input, shape index: {}]   ;;  %s847_s8 = inlined_call_operand.hbm [shape: bf16[32,32], index: 8, kind: input, shape index: {}]   ;;  %s848_s9 = inlined_call_operand.hbm [shape: bf16[32,32], index: 9, kind: input, shape index: {}]   ;;  %s849_s10 = inlined_call_operand.vmem [shape: bf16[16,16], index: 10, kind: input, shape index: {}]   ;;  %s850_s11 = inlined_call_operand.vmem [shape: f32[1,32], index: 11, kind: input, shape index: {}]   ;;  %s851_s12 = inlined_call_operand.vmem [shape: f32[1,32], index: 12, kind: input, shape index: {}]   ;;  %s852_s13 = inlined_call_operand.vmem [shape: f32[1,16], index: 13, kind: input, shape index: {}]   ;;  %s853_s14 = inlined_call_operand.hbm [shape: f32[16,32], index: 14, kind: output, shape index: {0}]   ;;  %s854_s15 = inlined_call_operand.hbm [shape: f32[16,32], index: 15, kind: output, shape index: {1}]   ;;  %s855_s16 = inlined_call_operand.hbm [shape: f32[16,16], index: 16, kind: output, shape index: {2}]  }
   0x1   :  { %857 = sst [smem:[#allocation23_spill]] %s839_s0 }
   0x2   :  { %22 = vsyncpa [#allocation3], 0 }
   0x3   :  { %23 = vsyncpa [#allocation6], 0 }
   0x4   :  { %24 = vsyncpa [#allocation9], 0 }
   0x5   :  { %25 = vsyncpa [#allocation12], 0 }
   0x6   :  { %26 = vsyncpa [#allocation4], 0 }
   0x7   :  { %27 = vsyncpa [#allocation15], 0  ;;  %s53_s23 = sshll.u32 %s844_s5, 4  ;;  %s647_s24 = smov [#allocation5]   ;;  %s54_s23 = int_to_ptr.hbm [resolvable:$true] %s53_s23 }
   0x8   :  { %s55_s25 = sshll.u32 %s647_s24, 4  ;;  %s79_s28 = sshll.u32 %s846_s7, 4  ;;  %s56_s25 = int_to_ptr.vmem [resolvable:$true] %s55_s25  ;;  %s80_s28 = int_to_ptr.hbm [resolvable:$true] %s79_s28 }
   0x9   :  { %s648_s29 = smov 128   ;;  %s649_s30 = smov 8  }
   0xa   :  { %61 = dma.hbm_to_vmem [thread:$0]  %s54_s23, 256, %s56_s25, [#allocation6], %s648_s29, %s648_s29, %s649_s30  }
   0xb   :  { %s650_s0 = smov [#allocation8]   ;;  %s40_s5 = sshll.u32 %s843_s4, 4  ;;  %s41_s5 = int_to_ptr.hbm [resolvable:$true] %s40_s5 }
   0xc   :  { %s81_s17 = sshll.u32 %s650_s0, 4  ;;  %s66_s21 = sshll.u32 %s845_s6, 4  ;;  %s82_s17 = int_to_ptr.vmem [resolvable:$true] %s81_s17  ;;  %s67_s21 = int_to_ptr.hbm [resolvable:$true] %s66_s21 }
   0xd   :  { %87 = dma.hbm_to_vmem [thread:$0]  %s80_s28, 256, %s82_s17, [#allocation9], %s648_s29, %s648_s29, %s649_s30  }
   0xe   :  { %s651_s22 = smov [#allocation2]   ;;  %s652_s23 = smov [#allocation7]  }
   0xf   :  { %s42_s24 = sshll.u32 %s651_s22, 4  ;;  %s68_s4 = sshll.u32 %s652_s23, 4  ;;  %s43_s24 = int_to_ptr.vmem [resolvable:$true] %s42_s24  ;;  %s69_s4 = int_to_ptr.vmem [resolvable:$true] %s68_s4 }
  0x10   :  { %48 = dma.hbm_to_vmem [thread:$0]  %s41_s5, 256, %s43_s24, [#allocation3], %s648_s29, %s648_s29, %s649_s30  }
  0x11   :  { %s92_s27 = sshll.u32 %s847_s8, 4  ;;  %s653_s6 = smov [#allocation10]   ;;  %s93_s27 = int_to_ptr.hbm [resolvable:$true] %s92_s27 }
  0x12   :  { %74 = dma.hbm_to_vmem [thread:$0]  %s67_s21, 256, %s69_s4, [#allocation6], %s648_s29, %s648_s29, %s649_s30  }
  0x13   :  { %s94_s28 = sshll.u32 %s653_s6, 4  ;;  %s105_s18 = sshll.u32 %s848_s9, 4  ;;  %s95_s28 = int_to_ptr.vmem [resolvable:$true] %s94_s28  ;;  %s106_s18 = int_to_ptr.hbm [resolvable:$true] %s105_s18 }
  0x14   :  { %s654_s19 = smov 64   ;;  %s655_s5 = smov 4  }
  0x15   :  { %100 = dma.hbm_to_vmem [thread:$0]  %s93_s27, 256, %s95_s28, [#allocation9], %s654_s19, %s654_s19, %s655_s5  }
  0x16   :  { %s656_s7 = smov [#allocation11]  }
  0x17   :  { %s107_s20 = sshll.u32 %s656_s7, 4  ;;  %s108_s20 = int_to_ptr.vmem [resolvable:$true] %s107_s20 }
  0x18   :  { %113 = dma.hbm_to_vmem [thread:$0]  %s106_s18, 256, %s108_s20, [#allocation12], %s654_s19, %s654_s19, %s655_s5  }
  0x19   :  { %635 = dma.done.wait [#allocation3], 256  }
  0x1a   :  { %636 = vsyncadd [#allocation3], 4294967040 }
  0x1b   :  { %637 = dma.done.wait [#allocation6], 512  }
  0x1c   :  { %638 = vsyncadd [#allocation6], 4294966784 }
  0x1d   :  { %639 = dma.done.wait [#allocation9], 512  }
  0x1e   :  { %640 = vsyncadd [#allocation9], 4294966784 }
  0x1f   :  { %641 = dma.done.wait [#allocation12], 256  }
  0x20   :  { %642 = vsyncadd [#allocation12], 4294967040  ;;  %v657_v0 = vmov 0   ;;  %v149_v1 = vld [vmem:[%s840_s1] sm:$0xff]  ;;  %s858_s24 = sld [smem:[#allocation23_spill]]  ;;  %v150_v3 = vld [vmem:[%s840_s1 + $0x8] sm:$0xff] }
  0x21   :  { %415 = vset.pattern.permute.xlu1 %v657_v0  ;;  %414 = vset.pattern.permute.xlu0 %v657_v0  ;;  %v396_v5 = vld [vmem:[#allocation10 + $0x8] sm:$0xff]  ;;  %v398_v6 = vld [vmem:[#allocation11 + $0x8] sm:$0xff]  ;;  %v395_v7 = vld [vmem:[#allocation10] sm:$0xff]  ;;  %vm202_vm0 = vcmask 261120   ;;  %vm295_vm1 = vcmask 130048   ;;  %s658_s21 = smov [#allocation13]  }
  0x22   :  { %169 = vperm.xlu1 %415, %v149_v1   ;;  %212 = vmatpush.bf16.msra.mxu0 %v396_v5  ;;  %v397_v8 = vld [vmem:[#allocation11] sm:$0xff]  ;;  %v399_v9 = vld [vmem:[%s849_s10] sm:$0xff]  ;;  %v166_v18 = vld [vmem:[#allocation5 + $0x8] sm:$0xff]  ;;  %s319_s22 = sshll.u32 %s658_s21, 4  ;;  %s321_s23 = sshll.u32 %s853_s14, 4  ;;  %s320_s22 = int_to_ptr.vmem [resolvable:$true] %s319_s22  ;;  %s322_s23 = int_to_ptr.hbm [resolvable:$true] %s321_s23 }
  0x23   :  { %262 = vmatpush.bf16.msra.mxu1 %v398_v6  ;;  %306 = vmatpush.bf16.msra.mxu2 %v399_v9  ;;  %v165_v12 = vld [vmem:[#allocation5] sm:$0xff]  ;;  %v226_v13 = vld [vmem:[#allocation7] sm:$0xff]  ;;  %v227_v19 = vld [vmem:[#allocation7 + $0x8] sm:$0xff]  ;;  %s334_s27 = sshll.u32 %s854_s15, 4  ;;  %s347_s28 = sshll.u32 %s855_s16, 4  ;;  %s335_s27 = int_to_ptr.hbm [resolvable:$true] %s334_s27  ;;  %s348_s28 = int_to_ptr.hbm [resolvable:$true] %s347_s28 }
  0x24   :  { %v276_v14 = vld [vmem:[#allocation8] sm:$0xff]  ;;  %v151_v15 = vld [vmem:[%s841_s2] sm:$0xff]  ;;  %v277_v20 = vld [vmem:[#allocation8 + $0x8] sm:$0xff] }
  0x25   :  { %v222_v16 = vld [vmem:[%s842_s3] sm:$0xff]  ;;  %v152_v21 = vld [vmem:[%s841_s2 + $0x8] sm:$0xff] }
  0x26   :  { %v147_v2 = vld [vmem:[%s858_s24] sm:$0xff]  ;;  %v148_v4 = vld [vmem:[%s858_s24 + $0x8] sm:$0xff]  ;;  %213 = vmatpush.bf16.msra.mxu0 %v395_v7 }
  0x27   :  { %155 = vperm.xlu0 %414, %v147_v2   ;;  %263 = vmatpush.bf16.msra.mxu1 %v397_v8  ;;  %v272_v17 = vld [vmem:[#allocation2] sm:$0xff]  ;;  %v223_v24 = vld [vmem:[%s842_s3 + $0x8] sm:$0xff] }
  0x28   :  { %v273_v25 = vld [vmem:[#allocation2 + $0x8] sm:$0xff]  ;;  %v416_v47 = vld [vmem:[%s850_s11] ss:$0 sm:$0xff] }
  0x29   :  { %v417_v48 = vld [vmem:[%s851_s12] ss:$0 sm:$0xff]  ;;  %s659_s12 = smov [#allocation14]  }
  0x2a   :  { %174 = vperm.xlu1 %415, %v150_v3   ;;  %v418_v53 = vld [vmem:[%s852_s13] ss:$0 sm:$0xff]  ;;  %s332_s4 = sshll.u32 %s659_s12, 4  ;;  %s660_s13 = smov [#allocation16]   ;;  %s333_s4 = int_to_ptr.vmem [resolvable:$true] %s332_s4 }
  0x2b   :  { %s345_s14 = sshll.u32 %s660_s13, 4  ;;  %s346_s14 = int_to_ptr.vmem [resolvable:$true] %s345_s14 }
  0x2f   :  { %160 = vperm.xlu0 %414, %v148_v4  }
  0x94   :  { %v170_v10 = vpop.permute.xlu1 %169 }
  0x95   :  { %v177_v22 = vmul.f32 %v170_v10, %v165_v12  ;;  %v228_v26 = vmul.f32 %v226_v13, %v170_v10  ;;  %v278_v27 = vmul.f32 %v276_v14, %v170_v10 }
  0x99   :  { %v156_v11 = vpop.permute.xlu0 %155 }
  0x9a   :  { %v163_v23 = vmul.f32 %v156_v11, %v151_v15  ;;  %v224_v28 = vmul.f32 %v222_v16, %v156_v11  ;;  %v274_v29 = vmul.f32 %v272_v17, %v156_v11 }
  0x9c   :  { %v175_v30 = vpop.permute.xlu1 %174  ;;  %v179_v38 = vadd.f32 %v177_v22, %v163_v23  ;;  %v230_v40 = vadd.f32 %v228_v26, %v224_v28  ;;  %v280_v41 = vadd.f32 %v278_v27, %v274_v29 }
  0x9d   :  { %v178_v32 = vmul.f32 %v175_v30, %v166_v18  ;;  %v229_v33 = vmul.f32 %v227_v19, %v175_v30  ;;  %v279_v34 = vmul.f32 %v277_v20, %v175_v30 }
  0xa1   :  { %v161_v31 = vpop.permute.xlu0 %160 }
  0xa2   :  { %v164_v35 = vmul.f32 %v161_v31, %v152_v21  ;;  %v225_v36 = vmul.f32 %v223_v24, %v161_v31  ;;  %v275_v37 = vmul.f32 %v273_v25, %v161_v31 }
  0xa4   :  { %v180_v39 = vadd.f32 %v178_v32, %v164_v35  ;;  %v231_v42 = vadd.f32 %v229_v33, %v225_v36  ;;  %v281_v43 = vadd.f32 %v279_v34, %v275_v37 }
  0xa6   :  { %v181_v44 = vpack.c.bf16 %v180_v39, %v179_v38  ;;  %v232_v45 = vpack.c.bf16 %v231_v42, %v230_v40  ;;  %v282_v46 = vpack.c.bf16 %v281_v43, %v280_v41 }
  0xa8   :  { %380 = vmatmul.msk.bf16.vlgmr.msra.gmra.mxu0 %vm202_vm0, %v181_v44  ;;  %389 = vmatmul.msk.bf16.vlgmr.msra.gmra.mxu1 %vm202_vm0, %v232_v45 }
  0xa9   :  { %394 = vmatmul.msk.bf16.vlgmr.msra.gmra.mxu2 %vm295_vm1, %v282_v46 }
 0x125   :  { %v215_v49 = vpop.f32.mrf.mxu0  ;;  %v265_v51 = vpop.f32.mrf.mxu1 }
 0x126   :  { %v216_v50 = vadd.f32 %v416_v47, %v215_v49  ;;  %v266_v52 = vadd.f32 %v417_v48, %v265_v51 }
 0x128   :  { %220 = vst.msk [vmem:[#allocation13] sm:$0xff] %vm202_vm0, %v216_v50 }
 0x129   :  { %270 = vst.msk [vmem:[#allocation14] sm:$0xff] %vm202_vm0, %v266_v52 }
 0x12c   :  { %v308_v54 = vpop.f32.mrf.mxu2 }
 0x12d   :  { %v309_v55 = vadd.f32 %v418_v53, %v308_v54  ;;  %v217_v56 = vpop.f32.mrf.mxu0  ;;  %v267_v58 = vpop.f32.mrf.mxu1 }
 0x12e   :  { %v218_v57 = vadd.f32 %v416_v47, %v217_v56  ;;  %v268_v59 = vadd.f32 %v417_v48, %v267_v58 }
 0x12f   :  { %313 = vst.msk [vmem:[#allocation16] sm:$0xff] %vm295_vm1, %v309_v55 }
 0x130   :  { %221 = vst.msk [vmem:[#allocation13 + $0x8] sm:$0xff] %vm202_vm0, %v218_v57 }
 0x131   :  { %271 = vst.msk [vmem:[#allocation14 + $0x8] sm:$0xff] %vm202_vm0, %v268_v59  ;;  %327 = dma.vmem_to_hbm [thread:$0]  %s320_s22, 256, %s322_s23, [#allocation4], %s648_s29, %s648_s29, %s649_s30  }
 0x132   :  { %340 = dma.vmem_to_hbm [thread:$0]  %s333_s4, 256, %s335_s27, [#allocation15], %s648_s29, %s648_s29, %s649_s30  }
 0x134   :  { %v310_v60 = vpop.f32.mrf.mxu2 }
 0x135   :  { %v311_v61 = vadd.f32 %v418_v53, %v310_v60 }
 0x137   :  { %314 = vst.msk [vmem:[#allocation16 + $0x8] sm:$0xff] %vm295_vm1, %v311_v61 }
 0x138   :  { %353 = dma.vmem_to_hbm [thread:$0]  %s346_s14, 256, %s348_s28, [#allocation15], %s648_s29, %s648_s29, %s649_s30  }
 0x139   :  { %643 = dma.done.wait [#allocation4], 256  }
 0x13a   :  { %644 = vsyncadd [#allocation4], 4294967040 }
 0x13b   :  { %645 = dma.done.wait [#allocation15], 512  }
 0x13c   :  { %646 = vsyncadd [#allocation15], 4294966784 }
 0x13d   :  { %366 = vsyncpa [#allocation3], 1 }
 0x13e   :  { %367 = vsyncpa [#allocation6], 1 }
 0x13f   :  { %368 = vsyncpa [#allocation9], 1 }
 0x140   :  { %369 = vsyncpa [#allocation12], 1 }
 0x141   :  { %370 = vsyncpa [#allocation4], 1 }
 0x142   :  { %371 = vsyncpa [#allocation15], 1 }

</bundles_post_ra>
